<compile_context>
chip_gen: v5e
topology: v5e:2x2
jax: 0.10.0
libtpu: 0.0.40
codegen_flags: <defaults>
</compile_context>

<pallas_src>
import functools

import jax
import jax.numpy as jnp
from jax import lax
from jax.experimental import pallas as pl
from jax.experimental.pallas import tpu as pltpu


def _disc_conv_kernel(s2d_ref, w_ref, b_ref, mask_ref, out_ref, *,
                      ws, ho, wo, use_instance_norm, eps, neg_slope):
    """One (batch sample, Cout-tile) grid step.

    s2d_ref : (1, 4*Cin, Hs*Ws + 1) bf16  space-to-depth'd padded input, flattened spatial
    w_ref   : (4, Tco, 4*Cin)       bf16  one (dh, dw) weight block per leading index
    b_ref   : (Tco, 1)              f32   conv bias
    mask_ref: (1, Ho*Ws)            f32   1.0 on valid spatial columns, 0.0 on overlap junk
    out_ref : (1, Tco, Ho*Ws)       f32   lane-dense conv -> IN -> LeakyReLU result
    """
    L = ho * ws
    tco = out_ref.shape[1]

    # Conv as 4 accumulated matmuls over shifted contiguous slices (statically unrolled).
    acc = jnp.zeros((tco, L), jnp.float32)
    for d in range(4):                     # d = 2*dh + dw, dh/dw in {0, 1}
        dh, dw = d // 2, d % 2
        start = dh * ws + dw
        x_d = s2d_ref[0, :, start:start + L]                  # (4*Cin, L) bf16
        acc = acc + jnp.dot(w_ref[d], x_d,
                            preferred_element_type=jnp.float32)
    acc = acc + b_ref[...]                                    # broadcast (Tco, 1)

    if use_instance_norm:
        # InstanceNorm2d (affine=False): per-(n, c) stats over spatial dims, biased
        # variance, eps=1e-5.  Single pass (masked sum / sum-of-squares) in f32.
        m = mask_ref[...]                                     # (1, L)
        inv_cnt = 1.0 / float(ho * wo)
        s1 = jnp.sum(acc * m, axis=1, keepdims=True)          # (Tco, 1)
        s2 = jnp.sum(acc * acc * m, axis=1, keepdims=True)
        mean = s1 * inv_cnt
        var = jnp.maximum(s2 * inv_cnt - mean * mean, 0.0)
        acc = (acc - mean) * lax.rsqrt(var + eps)

    # LeakyReLU(0.2)
    acc = jnp.where(acc >= 0, acc, neg_slope * acc)
    out_ref[0] = acc.astype(out_ref.dtype)


def disc_conv_block(x_nchw, weight, bias, *, is_first=False, eps=1e-5, neg_slope=0.2):
    """Forward pass of DiscConvBlock (stride=2).

    x_nchw: (N, Cin, H, W) float32
    weight: (Cout, Cin, 4, 4)  (PyTorch Conv2d layout)
    bias:   (Cout,)
    returns (N, Cout, H//2, W//2) float32
    """
    N, Cin, H, W = x_nchw.shape
    Cout = weight.shape[0]
    assert weight.shape == (Cout, Cin, 4, 4)
    assert H % 2 == 0 and W % 2 == 0, "stride-2 k=4 p=1 path expects even H, W"

    Ho, Wo = H // 2, W // 2
    Hs, Ws = Ho + 1, Wo + 1          # space-to-depth grid of the padded input
    L = Ho * Ws                      # flattened kernel-output width (incl. 1 junk col/row)
    Lin = Hs * Ws + 1                # +1 so all four shifted slices stay in bounds
    C4 = 4 * Cin

    # ---- layout glue: pad + space-to-depth (one pass over the input; no im2col in HBM) ----
    xp = jnp.pad(x_nchw, ((0, 0), (0, 0), (1, 1), (1, 1)))
    xr = xp.reshape(N, Cin, Hs, 2, Ws, 2)                   # (n, cin, i, a, j, b)
    s2d = xr.transpose(0, 3, 5, 1, 2, 4).reshape(N, C4, Hs * Ws)   # channel = (2a+b)*Cin+cin
    s2d = jnp.pad(s2d, ((0, 0), (0, 0), (0, 1))).astype(jnp.bfloat16)   # (N, C4, Lin)

    # weight: (Cout, Cin, kh=2dh+a, kw=2dw+b) -> (d=2dh+dw, Cout, (2a+b)*Cin+cin), bf16.
    wt = (weight.reshape(Cout, Cin, 2, 2, 2, 2)
                .transpose(2, 4, 0, 3, 5, 1)
                .reshape(4, Cout, C4)
                .astype(jnp.bfloat16))
    b2d = bias.reshape(Cout, 1).astype(jnp.float32)

    # Valid-column mask: positions with (p % Ws) == Ws-1 are overlap junk, excluded from IN.
    col = jnp.arange(L, dtype=jnp.int32) % Ws
    mask = (col != (Ws - 1)).astype(jnp.float32).reshape(1, L)

    # Cout tiling: second parallel grid axis (helps v7x's 2 TCs at small N) and bounds the
    # per-step weight block for deep layers.
    tco = 128 if (Cout % 128 == 0) else Cout
    n_co = Cout // tco

    kernel = functools.partial(
        _disc_conv_kernel, ws=Ws, ho=Ho, wo=Wo,
        use_instance_norm=not is_first, eps=eps, neg_slope=neg_slope)

    blk_bytes = (C4 * Lin * 2          # s2d block (bf16)
                 + 4 * tco * C4 * 2    # weight block (bf16)
                 + tco * 4             # bias
                 + L * 4               # mask
                 + tco * L * 4)        # output block (f32)
    vmem_limit = int(min(64 * 1024 * 1024, max(32 * 1024 * 1024, 6 * blk_bytes)))

    cost = pl.CostEstimate(
        flops=2 * N * Ho * Wo * (16 * Cin) * Cout,
        transcendentals=N * Cout,
        bytes_accessed=int(N * C4 * Lin * 2 + 4 * Cout * C4 * 2
                           + Cout * 4 + L * 4 + N * Cout * L * 4),
    )

    out = pl.pallas_call(
        kernel,
        out_shape=jax.ShapeDtypeStruct((N, Cout, L), jnp.float32),
        grid=(N, n_co),
        in_specs=[
            pl.BlockSpec((1, C4, Lin), lambda n, j: (n, 0, 0)),
            pl.BlockSpec((4, tco, C4), lambda n, j: (0, j, 0)),
            pl.BlockSpec((tco, 1), lambda n, j: (j, 0)),
            pl.BlockSpec((1, L), lambda n, j: (0, 0)),
        ],
        out_specs=pl.BlockSpec((1, tco, L), lambda n, j: (n, j, 0)),
        compiler_params=pltpu.CompilerParams(
            dimension_semantics=("parallel", "parallel"),
            vmem_limit_bytes=vmem_limit),
        cost_estimate=cost,
    )(s2d, wt, b2d, mask)

    # (N, Cout, Ho*Ws) is already channel-major: reshape and drop the overlap column.
    # No NCHW transpose needed.
    out = out.reshape(N, Cout, Ho, Ws)[..., :Wo]
    return out


def _reference(x, weight, bias, *, is_first, eps=1e-5, neg_slope=0.2):
    """Pure-JAX reference (with bf16-rounded operands to match the kernel's MXU inputs)."""
    xb = x.astype(jnp.bfloat16).astype(jnp.float32)
    wb = weight.astype(jnp.bfloat16).astype(jnp.float32)
    y = lax.conv_general_dilated(
        xb, wb, window_strides=(2, 2), padding=((1, 1), (1, 1)),
        dimension_numbers=("NCHW", "OIHW", "NCHW"))
    y = y + bias.reshape(1, -1, 1, 1)
    if not is_first:
        mean = jnp.mean(y, axis=(2, 3), keepdims=True)
        var = jnp.mean((y - mean) ** 2, axis=(2, 3), keepdims=True)
        y = (y - mean) * lax.rsqrt(var + eps)
    return jnp.where(y >= 0, y, neg_slope * y)


if __name__ == "__main__":
    # Small shapes: batch=2, channels_in=4, channels_out=8, spatial=16.
    N, Cin, Cout, H, W = 2, 4, 8, 16, 16

    key = jax.random.PRNGKey(0)
    kx, kw, kb = jax.random.split(key, 3)
    x = jax.random.normal(kx, (N, Cin, H, W), dtype=jnp.float32)
    fan_in = Cin * 4 * 4
    weight = jax.random.normal(kw, (Cout, Cin, 4, 4), dtype=jnp.float32) / jnp.sqrt(fan_in)
    bias = jax.random.uniform(kb, (Cout,), dtype=jnp.float32, minval=-0.1, maxval=0.1)

    for is_first in (False, True):
        y = disc_conv_block(x, weight, bias, is_first=is_first)
        y = jax.block_until_ready(y)
        assert y.shape == (N, Cout, H // 2, W // 2), y.shape
        assert bool(jnp.all(jnp.isfinite(y)))
        y_ref = _reference(x, weight, bias, is_first=is_first)
        err = float(jnp.max(jnp.abs(y - y_ref)))
        assert err < 2e-2, f"max abs err {err} (is_first={is_first})"

    print("KERNEL_OK")
</pallas_src>

<mosaic_0001>
module attributes {stable_mosaic.version = 11 : i64} {
  func.func @_disc_conv_kernel(%arg0: i32, %arg1: i32, %arg2: memref<1x16x82xbf16, #tpu.memory_space<vmem>>, %arg3: memref<4x8x16xbf16, #tpu.memory_space<vmem>>, %arg4: memref<8x1xf32, #tpu.memory_space<vmem>>, %arg5: memref<1x72xf32, #tpu.memory_space<vmem>>, %arg6: memref<1x8x72xf32, #tpu.memory_space<vmem>>) attributes {dimension_semantics = [#tpu.dimension_semantics<parallel>, #tpu.dimension_semantics<parallel>], iteration_bounds = array<i64: 2, 1>, scalar_prefetch = 0 : i64, scratch_operands = 0 : i64, tpu.core_type = #tpu.core_type<tc>, window_params = [{transform_indices = @transform_0, window_bounds = array<i64: 1, 16, 82>}, {transform_indices = @transform_1, window_bounds = array<i64: 4, 8, 16>}, {transform_indices = @transform_2, window_bounds = array<i64: 8, 1>}, {pipeline_mode = #tpu.pipeline_mode<synchronous>, transform_indices = @transform_3, window_bounds = array<i64: 1, 72>}, {transform_indices = @transform_4, window_bounds = array<i64: 1, 8, 72>}]} {
    %cst = arith.constant 0.000000e+00 : f32
    %0 = vector.broadcast %cst : f32 to vector<8x72xf32>
    %c0 = arith.constant 0 : index
    %c0_0 = arith.constant 0 : index
    %c0_1 = arith.constant 0 : index
    %1 = vector.load %arg2[%c0, %c0_0, %c0_1] : memref<1x16x82xbf16, #tpu.memory_space<vmem>>, vector<1x16x72xbf16>
    %2 = vector.shape_cast %1 : vector<1x16x72xbf16> to vector<16x72xbf16>
    %c0_2 = arith.constant 0 : index
    %c0_3 = arith.constant 0 : index
    %c0_4 = arith.constant 0 : index
    %3 = vector.load %arg3[%c0_2, %c0_3, %c0_4] : memref<4x8x16xbf16, #tpu.memory_space<vmem>>, vector<1x8x16xbf16>
    %4 = vector.shape_cast %3 : vector<1x8x16xbf16> to vector<8x16xbf16>
    %cst_5 = arith.constant dense<0.000000e+00> : vector<8x72xf32>
    %5 = tpu.matmul %4, %2, %cst_5 {dimension_numbers = #tpu.dot_dimension_numbers<[1], [0], [0], [1], [0, 0, 1, 1], [], []>} : vector<8x16xbf16>, vector<16x72xbf16>, vector<8x72xf32> -> vector<8x72xf32>
    %6 = arith.addf %0, %5 : vector<8x72xf32>
    %c0_6 = arith.constant 0 : index
    %c0_7 = arith.constant 0 : index
    %c1 = arith.constant 1 : index
    %7 = vector.load %arg2[%c0_6, %c0_7, %c1] : memref<1x16x82xbf16, #tpu.memory_space<vmem>>, vector<1x16x72xbf16>
    %8 = vector.shape_cast %7 : vector<1x16x72xbf16> to vector<16x72xbf16>
    %c1_8 = arith.constant 1 : index
    %c0_9 = arith.constant 0 : index
    %c0_10 = arith.constant 0 : index
    %9 = vector.load %arg3[%c1_8, %c0_9, %c0_10] : memref<4x8x16xbf16, #tpu.memory_space<vmem>>, vector<1x8x16xbf16>
    %10 = vector.shape_cast %9 : vector<1x8x16xbf16> to vector<8x16xbf16>
    %cst_11 = arith.constant dense<0.000000e+00> : vector<8x72xf32>
    %11 = tpu.matmul %10, %8, %cst_11 {dimension_numbers = #tpu.dot_dimension_numbers<[1], [0], [0], [1], [0, 0, 1, 1], [], []>} : vector<8x16xbf16>, vector<16x72xbf16>, vector<8x72xf32> -> vector<8x72xf32>
    %12 = arith.addf %6, %11 : vector<8x72xf32>
    %c0_12 = arith.constant 0 : index
    %c0_13 = arith.constant 0 : index
    %c9 = arith.constant 9 : index
    %13 = vector.load %arg2[%c0_12, %c0_13, %c9] : memref<1x16x82xbf16, #tpu.memory_space<vmem>>, vector<1x16x72xbf16>
    %14 = vector.shape_cast %13 : vector<1x16x72xbf16> to vector<16x72xbf16>
    %c2 = arith.constant 2 : index
    %c0_14 = arith.constant 0 : index
    %c0_15 = arith.constant 0 : index
    %15 = vector.load %arg3[%c2, %c0_14, %c0_15] : memref<4x8x16xbf16, #tpu.memory_space<vmem>>, vector<1x8x16xbf16>
    %16 = vector.shape_cast %15 : vector<1x8x16xbf16> to vector<8x16xbf16>
    %cst_16 = arith.constant dense<0.000000e+00> : vector<8x72xf32>
    %17 = tpu.matmul %16, %14, %cst_16 {dimension_numbers = #tpu.dot_dimension_numbers<[1], [0], [0], [1], [0, 0, 1, 1], [], []>} : vector<8x16xbf16>, vector<16x72xbf16>, vector<8x72xf32> -> vector<8x72xf32>
    %18 = arith.addf %12, %17 : vector<8x72xf32>
    %c0_17 = arith.constant 0 : index
    %c0_18 = arith.constant 0 : index
    %c10 = arith.constant 10 : index
    %19 = vector.load %arg2[%c0_17, %c0_18, %c10] : memref<1x16x82xbf16, #tpu.memory_space<vmem>>, vector<1x16x72xbf16>
    %20 = vector.shape_cast %19 : vector<1x16x72xbf16> to vector<16x72xbf16>
    %c3 = arith.constant 3 : index
    %c0_19 = arith.constant 0 : index
    %c0_20 = arith.constant 0 : index
    %21 = vector.load %arg3[%c3, %c0_19, %c0_20] : memref<4x8x16xbf16, #tpu.memory_space<vmem>>, vector<1x8x16xbf16>
    %22 = vector.shape_cast %21 : vector<1x8x16xbf16> to vector<8x16xbf16>
    %cst_21 = arith.constant dense<0.000000e+00> : vector<8x72xf32>
    %23 = tpu.matmul %22, %20, %cst_21 {dimension_numbers = #tpu.dot_dimension_numbers<[1], [0], [0], [1], [0, 0, 1, 1], [], []>} : vector<8x16xbf16>, vector<16x72xbf16>, vector<8x72xf32> -> vector<8x72xf32>
    %24 = arith.addf %18, %23 : vector<8x72xf32>
    %c0_22 = arith.constant 0 : index
    %c0_23 = arith.constant 0 : index
    %25 = vector.load %arg4[%c0_22, %c0_23] : memref<8x1xf32, #tpu.memory_space<vmem>>, vector<8x1xf32>
    %26 = vector.broadcast %25 : vector<8x1xf32> to vector<8x72xf32>
    %27 = arith.addf %24, %26 : vector<8x72xf32>
    %c0_24 = arith.constant 0 : index
    %c0_25 = arith.constant 0 : index
    %28 = vector.load %arg5[%c0_24, %c0_25] : memref<1x72xf32, #tpu.memory_space<vmem>>, vector<1x72xf32>
    %29 = vector.broadcast %28 : vector<1x72xf32> to vector<8x72xf32>
    %30 = arith.mulf %27, %29 : vector<8x72xf32>
    %cst_26 = arith.constant dense<0.000000e+00> : vector<8xf32>
    %31 = vector.multi_reduction <add>, %30, %cst_26 [1] : vector<8x72xf32> to vector<8xf32>
    %32 = vector.shape_cast %31 : vector<8xf32> to vector<8x1xf32>
    %33 = arith.mulf %27, %27 : vector<8x72xf32>
    %34 = vector.broadcast %28 : vector<1x72xf32> to vector<8x72xf32>
    %35 = arith.mulf %33, %34 : vector<8x72xf32>
    %cst_27 = arith.constant dense<0.000000e+00> : vector<8xf32>
    %36 = vector.multi_reduction <add>, %35, %cst_27 [1] : vector<8x72xf32> to vector<8xf32>
    %37 = vector.shape_cast %36 : vector<8xf32> to vector<8x1xf32>
    %cst_28 = arith.constant 1.562500e-02 : f32
    %38 = vector.broadcast %cst_28 : f32 to vector<8x1xf32>
    %39 = arith.mulf %32, %38 : vector<8x1xf32>
    %cst_29 = arith.constant 1.562500e-02 : f32
    %40 = vector.broadcast %cst_29 : f32 to vector<8x1xf32>
    %41 = arith.mulf %37, %40 : vector<8x1xf32>
    %42 = arith.mulf %39, %39 : vector<8x1xf32>
    %43 = arith.subf %41, %42 : vector<8x1xf32>
    %cst_30 = arith.constant 0.000000e+00 : f32
    %44 = vector.broadcast %cst_30 : f32 to vector<8x1xf32>
    %45 = arith.maximumf %43, %44 : vector<8x1xf32>
    %46 = vector.broadcast %39 : vector<8x1xf32> to vector<8x72xf32>
    %47 = arith.subf %27, %46 : vector<8x72xf32>
    %cst_31 = arith.constant 9.99999974E-6 : f32
    %48 = vector.broadcast %cst_31 : f32 to vector<8x1xf32>
    %49 = arith.addf %45, %48 : vector<8x1xf32>
    %50 = math.rsqrt %49 : vector<8x1xf32>
    %51 = vector.broadcast %50 : vector<8x1xf32> to vector<8x72xf32>
    %52 = arith.mulf %47, %51 : vector<8x72xf32>
    %cst_32 = arith.constant 0.000000e+00 : f32
    %53 = vector.broadcast %cst_32 : f32 to vector<8x72xf32>
    %54 = arith.cmpf oge, %52, %53 : vector<8x72xf32>
    %cst_33 = arith.constant 2.000000e-01 : f32
    %55 = vector.broadcast %cst_33 : f32 to vector<8x72xf32>
    %56 = arith.mulf %55, %52 : vector<8x72xf32>
    %57 = arith.select %54, %52, %56 : vector<8x72xi1>, vector<8x72xf32>
    %c0_34 = arith.constant 0 : index
    %c0_35 = arith.constant 0 : index
    %c0_36 = arith.constant 0 : index
    %58 = vector.load %arg6[%c0_34, %c0_35, %c0_36] : memref<1x8x72xf32, #tpu.memory_space<vmem>>, vector<1x8x72xf32>
    %59 = vector.shape_cast %58 : vector<1x8x72xf32> to vector<8x72xf32>
    %60 = vector.shape_cast %57 : vector<8x72xf32> to vector<1x8x72xf32>
    tpu.vector_store %arg6[%c0_34, %c0_35, %c0_36], %60 {strides = array<i32>} : memref<1x8x72xf32, #tpu.memory_space<vmem>>, vector<1x8x72xf32>,
    return
  }
  func.func @transform_0(%arg0: i32, %arg1: i32) -> (i32, i32, i32) {
    %c0_i32 = arith.constant 0 : i32
    %c0_i32_0 = arith.constant 0 : i32
    %c0_i32_1 = arith.constant 0 : i32
    return %arg0, %c0_i32, %c0_i32_0 : i32, i32, i32
  }
  func.func @transform_1(%arg0: i32, %arg1: i32) -> (i32, i32, i32) {
    %c0_i32 = arith.constant 0 : i32
    %c0_i32_0 = arith.constant 0 : i32
    %c0_i32_1 = arith.constant 0 : i32
    return %c0_i32, %arg1, %c0_i32_0 : i32, i32, i32
  }
  func.func @transform_2(%arg0: i32, %arg1: i32) -> (i32, i32) {
    %c0_i32 = arith.constant 0 : i32
    %c0_i32_0 = arith.constant 0 : i32
    return %arg1, %c0_i32 : i32, i32
  }
  func.func @transform_3(%arg0: i32, %arg1: i32) -> (i32, i32) {
    %c0_i32 = arith.constant 0 : i32
    %c0_i32_0 = arith.constant 0 : i32
    %c0_i32_1 = arith.constant 0 : i32
    return %c0_i32, %c0_i32_0 : i32, i32
  }
  func.func @transform_4(%arg0: i32, %arg1: i32) -> (i32, i32, i32) {
    %c0_i32 = arith.constant 0 : i32
    %c0_i32_0 = arith.constant 0 : i32
    return %arg0, %arg1, %c0_i32 : i32, i32, i32
  }
}

</mosaic_0001>

<bundles_post_ra>
// kernel: tpu_custom_call.1
= control target key start
LH: loop header
LB: loop body
LE: loop exit
PB: predicated region body
PF: predicated region fallthrough
CT: control target
= control target key end

     0   :  { %s994_s0 = inlined_call_operand.hbm [shape: bf16[2,16,82], index: 0, kind: input, shape index: {}]   ;;  %s995_s1 = inlined_call_operand.hbm [shape: bf16[4,8,16], index: 1, kind: input, shape index: {}]   ;;  %s996_s2 = inlined_call_operand.vmem [shape: f32[8,1], index: 2, kind: input, shape index: {}]   ;;  %s997_s3 = inlined_call_operand.vmem [shape: f32[1,72], index: 3, kind: input, shape index: {}]   ;;  %s998_s4 = inlined_call_operand.hbm [shape: f32[2,8,72], index: 4, kind: output, shape index: {}]  }
   0x1   :  { %1002 = sst [smem:[#allocation12_spill]] %s995_s1 }
   0x2   :  { %9 = vsyncpa [#allocation3], 0 }
   0x3   :  { %11 = vsyncpa [#allocation3 + $0x1], 0 }
   0x4   :  { %12 = vsyncpa [#allocation6], 0 }
   0x5   :  { %13 = vsyncpa [#allocation4], 0 }
   0x6   :  { %15 = vsyncpa [#allocation4 + $0x1], 0  ;;  %s822_s15 = smov 0   ;;  %s824_s16 = smov 0  }
   0x7   :  { %s826_s17 = smov 0   ;;  %s828_s18 = smov 0  }
   0x8   :  { %s830_s19 = smov 0   ;;  %s832_s20 = smov 0  }
   0x9 LB: > { %s531_s21 = sadd.s32 4294967295, %s788_s20   ;;  %s532_s22 = sadd.s32 4294967294, %s788_s20   ;;  %s788_s20 = sphi %s832_s20, %s21_s20   ;;  %s784_s19 = sphi %s830_s19, %s1019_s19   ;;  %s780_s18 = sphi %s828_s18, %s1018_s18   ;;  %s776_s17 = sphi %s826_s17, %s1017_s17   ;;  %s772_s16 = sphi %s824_s16, %s1016_s16   ;;  %s768_s15 = sphi %s822_s15, %s1015_s15  }
   0xa   : > { %p53_p0 = scmp.ne.s32.totalorder %s772_s16, %s768_s15  ;;  %p856_p1 = scmp.eq.s32.totalorder %s531_s21, 0 }
   0xb   : > { %p860_p2 = scmp.eq.s32.totalorder %s531_s21, 1  ;;  %p158_p3 = scmp.eq.s32.totalorder %s532_s22, 1 }
   0xc   : > { %p866_p4 = por %p856_p1, %p53_p0  ;;  %p533_p5 = scmp.ge.s32.totalorder %s788_s20, 1 }
   0xd   : > { %p871_p6 = por %p158_p3, %p53_p0  ;;  %p165_p7 = scmp.lt.s32.totalorder %s788_s20, 3 }
   0xe   : > { %s1007_s1 = sld [smem:[#allocation12_spill]]  ;;  %s790_s5 = smov [#allocation5]  }
   0xf   : > { %p879_p8 = pnand %p533_p5, %p165_p7  ;;  %s180_s6 = sshll.u32 %s790_s5, 4  ;;  %s181_s6 = int_to_ptr.vmem [resolvable:$true] %s180_s6 }
  0x10   : > { %p536_p11 = scmp.ge.s32.totalorder %s788_s20, 2  ;;  %s999_s7 = smov 64  }
  0x11   : > { %p566_p9 = pneg %p879_p8  ;;  %s1000_s8 = smov 4  }
  0x12   : > { %s33_s9 = sadd.s32 1, %s784_s19  ;;  %s40_s10 = sadd.s32 1, %s776_s17 }
  0x13   : > { %p567_p10 = pnand %p566_p9, %p856_p1  ;;  %p35_p12 = scmp.ge.s32.totalorder %s33_s9, 2 }
  0x14   : > { %s178_s29 = sshll.u32 %s1007_s1, 4  ;;  %p47_p13 = scmp.ne.s32.totalorder %s776_s17, %s772_s16  ;;  %s179_s29 = int_to_ptr.hbm [resolvable:$true] %s178_s29 }
  0x15   : > { %569 = dma.hbm_to_vmem [thread:$0]  (!%p567_p10), %s179_s29, 256, %s181_s6, [#allocation6], %s999_s7, %s999_s7, %s1000_s8  }
  0x16   : > { %p48_p0 = scmp.eq.s32.totalorder %s788_s20, 0  ;;  %s1021_s9 = smov (%p35_p12, %s33_s9), 0 }
  0x17   : > { %1009 = sst [smem:[#allocation11_spill]] %s1021_s9  ;;  %p904_p5 = por %p860_p2, %p47_p13 }
  0x18   : > { %p898_p3 = por %p48_p0, %p47_p13  ;;  %s37_s13 = ssub.s32 %s784_s19, %s1021_s9 }
  0x19   : > { %p579_p7 = scmp.lt.s32.totalorder %s788_s20, 2  ;;  %p38_p9 = scmp.eq.s32.totalorder %s37_s13, 0 }
  0x1a   : > { %s204_s14 = sand.u32 1, %s776_s17   ;;  %s556_s27 = sshll.u32 %s784_s19, 3 }
  0x1b   : > { %s537_s21 = sshll.u32 %s204_s14, 3  ;;  %s213_s5 = scalar_lea.hbm %s994_s0, %s556_s27 }
  0x1c   : > { %s913_s22 = scalar_select %p38_p9, %s776_s17, %s40_s10  }
  0x1d   : > { %s208_s6 = scalar_lea.vmem [#allocation2], %s537_s21  ;;  %s214_s24 = sshll.u32 %s213_s5, 4  ;;  %s215_s24 = int_to_ptr.hbm [resolvable:$true] %s214_s24 }
  0x1e   : > { %s216_s7 = sshll.u32 %s208_s6, 4  ;;  %p571_p2 = pnand %p579_p7, %p898_p3  ;;  %s217_s7 = int_to_ptr.vmem [resolvable:$true] %s216_s7 }
  0x1f   : > { %s205_s8 = scalar_lea.sflag [#allocation3], %s204_s14  ;;  %s1012_s1 = smov 4  }
  0x20   : > { %s1013_s9 = smov 64   ;;  %228 = sbr.rel (%p879_p8) target bundleno = 464 (0x1d0), region = 36 }
  0x21   : > { %573 = dma.hbm_to_vmem [thread:$0]  (!%p571_p2), %s215_s24, 128, %s217_s7, %s205_s8, %s1013_s9, %s1013_s9, %s1012_s1  }
  0x22   : > { %s927_s10 = sand.u32 (!%p879_p8), 1, %s772_s16  }
  0x23   : > { %s541_s13 = sshll.u32 (!%p879_p8), %s927_s10, 3  ;;  %s231_s21 = scalar_lea.sflag (!%p879_p8), [#allocation3], %s927_s10 }
  0x24   : > { %s234_s11 = scalar_lea.vmem (!%p879_p8), [#allocation2], %s541_s13 }
  0x25   : > { %755 = dma.done.wait (%p866_p4), %s231_s21, 128  }
  0x26   : > { %757 = vsyncadd (%p866_p4), %s231_s21, 4294967168 }
  0x27   : > { %759 = dma.done.wait (%p856_p1), [#allocation6], 256  }
  0x28   : > { %761 = vsyncadd (%p856_p1), [#allocation6], 4294967040  ;;  %v557_v0 = vld [vmem:[%s234_s11] sm:$0xff]  ;;  %s793_s1 = smov 119   ;;  %s794_s30 = smov 127   ;;  %vm287_vm0 = vcmask 130048  }
  0x29   : > { %323 = vrot.lane.b32.xlu0 %v557_v0, %s793_s1  ;;  %284 = vrot.lane.b32.xlu1 %v557_v0, %s794_s30  ;;  %s795_s7 = smov 118   ;;  %v276_v1 = vld [vmem:[#allocation5] sm:$0xf]  ;;  %v365_v2 = vld [vmem:[%s996_s2] sm:$0xff]  ;;  %v796_v3 = vmov 0   ;;  %vm377_vm1 = vcmask 588800  }
  0x2a   : > { %315 = vmatpush.bf16.msra.mxu1 %v557_v0  ;;  %637 = vset.pattern.permute.xlu1 %v796_v3  ;;  %v322_v6 = vld [vmem:[#allocation5 + $0x8] sm:$0xf]  ;;  %v278_v7 = vld [vmem:[#allocation5 + $0x4] sm:$0xf]  ;;  %v344_v9 = vld [vmem:[#allocation5 + $0xc] sm:$0xf] }
  0x2b   : > { %638 = vset.pattern.permute.xlu0 %v796_v3  ;;  %v639_v21 = vld [vmem:[%s997_s3] ss:$0 sm:$0xff]  ;;  %s553_s14 = sshll.u32 %s780_s18, 3  ;;  %s268_s5 = scalar_lea.vmem [#allocation7], %s541_s13 }
  0x2c   : > { %s420_s29 = scalar_lea.hbm %s998_s4, %s553_s14  ;;  %s422_s6 = sshll.u32 %s268_s5, 4  ;;  %s423_s6 = int_to_ptr.vmem [resolvable:$true] %s422_s6 }
  0x2d   : > { %549 = vmatmul.msk.bf16.vlgmr.msra.gmra.mxu1 %vm287_vm0, %v276_v1  ;;  %s424_s24 = sshll.u32 %s420_s29, 4  ;;  %s409_s18 = scalar_lea.sflag [#allocation4], %s927_s10  ;;  %s425_s24 = int_to_ptr.hbm [resolvable:$true] %s424_s24 }
  0x2e   : > { %s716_s21 = sshra.s32 %s425_s24, 4  ;;  %s722_s13 = scalar_lea.hbm %s998_s4, 16  ;;  %s717_s21 = int_to_ptr.hbm [resolvable:$true] %s716_s21 }
  0x2f   : > { %s718_s11 = scalar_lea.hbm %s717_s21, 8  ;;  %p723_p10 = scmp.lt.s32.totalorder %s717_s21, %s998_s4 }
  0x30   : > { %p719_p1 = scmp.ne.s32.totalorder %s717_s21, %s718_s11  ;;  %p724_p12 = scmp.lt.s32.totalorder %s722_s13, %s718_s11 }
  0x31   : > { %345 = vrot.lane.b32.xlu0 %v557_v0, %s795_s7  ;;  %368 = vperm.xlu1 %637, %v365_v2  }
  0x32   : > { %p720_p4 = pnand %p719_p1, %p904_p5  ;;  %p725_p13 = por %p724_p12, %p723_p10 }
  0x34   : > { %p721_p8 = pneg %p720_p4 }
  0x36   : > { %p726_p0 = pnand %p725_p13, %p721_p8 }
  0x9b   : > { %v324_v4 = vpop.permute.xlu0 %323  ;;  %v285_v5 = vpop.permute.xlu1 %284 }
  0x9c   : > { %336 = vmatpush.bf16.msra.mxu2 %v324_v4  ;;  %298 = vmatpush.bf16.msra.mxu0 %v285_v5 }
  0x9f   : > { %550 = vmatmul.msk.bf16.vlgmr.msra.gmra.mxu2 %vm287_vm0, %v322_v6  ;;  %548 = vmatmul.msk.bf16.vlgmr.msra.gmra.mxu0 %vm287_vm0, %v278_v7 }
  0xa3   : > { %v346_v8 = vpop.permute.xlu0 %345  ;;  %v369_v17 = vpop.permute.xlu1 %368 }
  0xa4   : > { %358 = vmatpush.bf16.msra.mxu3 %v346_v8 }
  0xa7   : > { %551 = vmatmul.msk.bf16.vlgmr.msra.gmra.mxu3 %vm287_vm0, %v344_v9 }
  0xaa   : > { %v317_v10 = vpop.f32.mrf.mxu1 }
  0xb2   : > { %v319_v11 = vpop.f32.mrf.mxu1 }
 0x11c   : > { %v300_v12 = vpop.f32.mrf.mxu0 }
 0x11d   : > { %v318_v14 = vadd.f32 %v317_v10, %v300_v12 }
 0x122   : > { %v338_v13 = vpop.f32.mrf.mxu2 }
 0x123   : > { %v342_v16 = vadd.f32 %v338_v13, %v318_v14 }
 0x124   : > { %v302_v15 = vpop.f32.mrf.mxu0 }
 0x12a   : > { %v340_v18 = vpop.f32.mrf.mxu2  ;;  %v360_v19 = vpop.f32.mrf.mxu3 }
 0x12b   : > { %v364_v20 = vadd.f32 %v360_v19, %v342_v16 }
 0x12d   : > { %v371_v22 = vadd.f32 %v369_v17, %v364_v20 }
 0x12f   : > { %v376_v23 = vmul.f32 %v639_v21, %v371_v22  ;;  %v381_v25 = vmul.f32 %v371_v22, %v371_v22 }
 0x131   : > { %v378_v24 = vsel %vm377_vm1, %v376_v23, 0.0  ;;  %v382_v27 = vmul.f32 %v639_v21, %v381_v25 }
 0x132   : > { %v362_v26 = vpop.f32.mrf.mxu3  ;;  %379 = vadd.xlane.f32.xlu2 %v378_v24 }
 0x133   : > { %v383_v28 = vsel %vm377_vm1, %v382_v27, 0.0 }
 0x13a   : > { %384 = vadd.xlane.f32.xlu2 %v383_v28 }
 0x1a5   : > { %v380_v29 = vpop.xlane.xlu2 %379 }
 0x1a6   : > { %v386_v30 = vmul.f32 0.015625, %v380_v29 }
 0x1a8   : > { %v388_v32 = vmul.f32 %v386_v30, %v386_v30  ;;  %v391_v43 = vsub.f32 %v371_v22, %v386_v30 }
 0x1ad   : > { %v385_v31 = vpop.xlane.xlu2 %384 }
 0x1ae   : > { %v387_v33 = vmul.f32 0.015625, %v385_v31 }
 0x1b0   : > { %v389_v34 = vsub.f32 %v387_v33, %v388_v32 }
 0x1b2   : > { %v390_v35 = vmax.f32 %v389_v34, 0.0 }
 0x1b4   : > { %v392_v36 = vadd.f32 1e-05, %v390_v35 }
 0x1b6   : > { %640 = vrsqrt.f32 %v392_v36  ;;  %vm399_vm3 = vweird.f32 %v392_v36 }
 0x1bc   : > { %v641_v37 = vpop.eup %640 }
 0x1bd   : > { %v394_v38 = vmul.f32 %v641_v37, %v392_v36  ;;  %vm400_vm2 = vweird.f32 %v641_v37 }
 0x1be   : > { %vm401_vm4 = vmor %vm399_vm3, %vm400_vm2 }
 0x1bf   : > { %v395_v39 = vmul.f32 %v641_v37, %v394_v38 }
 0x1c1   : > { %v396_v40 = vmul.f32 0.5, %v395_v39 }
 0x1c3   : > { %v397_v41 = vsub.f32 1.5, %v396_v40 }
 0x1c5   : > { %v398_v42 = vmul.f32 %v641_v37, %v397_v41 }
 0x1c7   : > { %v402_v44 = vsel %vm401_vm4, %v641_v37, %v398_v42 }
 0x1c8   : > { %v403_v45 = vmul.f32 %v402_v44, %v391_v43 }
 0x1ca   : > { %vm404_vm5 = vcmp.ge.f32.partialorder %v403_v45, 0.0  ;;  %v405_v46 = vmul.f32 0.2, %v403_v45 }
 0x1cc   : > { %v406_v47 = vsel %vm404_vm5, %v403_v45, %v405_v46 }
 0x1cd   : > { %407 = vst.msk [vmem:[%s268_s5] sm:$0xff] %vm377_vm1, %v406_v47 }
 0x1ce   : > { %729 = shalt.err (!%p726_p0)
}
 0x1cf   : > { %564 = dma.vmem_to_hbm [thread:$0]  (%p904_p5), %s423_s6, 128, %s425_s24, %s409_s18  }
 0x1d0 PF: > { %s436_s10 = sand.u32 1, %s768_s15   ;;  %p575_p3 = pnand %p536_p11, %p871_p6 }
 0x1d1   : > { %s437_s8 = scalar_lea.sflag [#allocation4], %s436_s10 }
 0x1d2   : > { %p576_p7 = pneg %p575_p3 }
 0x1d4   : > { %763 = dma.done.wait (%p576_p7), %s437_s8, 128  }
 0x1d5   : > { %765 = vsyncadd (%p576_p7), %s437_s8, 4294967168  ;;  %s21_s20 = sadd.s32 1, %s788_s20   ;;  %s1014_s12 = sld [smem:[#allocation11_spill]] }
 0x1d6   : > { %p18_p9 = scmp.ge.s32.totalorder %s21_s20, 4   ;;  %s1015_s15 = smov %s772_s16 }
 0x1d7   : > { %s1016_s16 = smov %s776_s17  ;;  %s1017_s17 = smov %s913_s22 }
 0x1d8   : > { %s1018_s18 = smov %s784_s19  ;;  %20 = sbr.rel (!%p18_p9) target bundleno = 9 (0x9), region = 92 }
 0x1db   : > { %s1019_s19 = smov %s1014_s12 }
 0x1dd   :  { %443 = vsyncpa [#allocation3], 1 }
 0x1de   :  { %445 = vsyncpa [#allocation3 + $0x1], 1 }
 0x1df   :  { %446 = vsyncpa [#allocation6], 1 }
 0x1e0   :  { %447 = vsyncpa [#allocation4], 1 }
 0x1e1   :  { %449 = vsyncpa [#allocation4 + $0x1], 1 }

</bundles_post_ra>
